<compile_context>
chip_gen: v6e
topology: v6e:2x2x1
jax: 0.10.0
libtpu: 0.0.40
codegen_flags: <defaults>
</compile_context>

<pallas_src>
import functools

import jax
import jax.numpy as jnp
from jax.experimental import pallas as pl
from jax.experimental.pallas import tpu as pltpu

LN_EPS = 1e-5


def _resblock_kernel(x_ref, w_ref, b_ref, g_ref, beta_ref, o_ref,
                     *, C, L, TB, K, pad_left, pad_right):
    """One block of TB batch samples per grid step, native (TB, C, L) I/O.

    x_ref    : (TB, C, L)   input block (native layout, no wrapper padding)
    w_ref    : (K*C, C)     conv weight, row order k*C + c_in, columns = c_out
    b_ref    : (1, C)       conv bias (row vector)
    g_ref    : (L, C)       LayerNorm gamma, transposed to channels-last
    beta_ref : (L, C)       LayerNorm beta, transposed to channels-last
    o_ref    : (TB, C, L)   output block (native layout)
    """
    # ---- in-kernel relayout to channels-last (last-two-dim swap only) -------
    xt = jnp.swapaxes(x_ref[...], 1, 2).astype(jnp.float32)      # (TB, L, C)

    # ---- 'same' zero padding along L (VMEM-local) ----------------------------
    parts = []
    if pad_left:
        parts.append(jnp.zeros((TB, pad_left, C), jnp.float32))
    parts.append(xt)
    if pad_right:
        parts.append(jnp.zeros((TB, pad_right, C), jnp.float32))
    xpad = jnp.concatenate(parts, axis=1) if len(parts) > 1 else xt  # (TB, Lp, C)

    # ---- Conv1d('same') on the MXU -------------------------------------------
    # conv[(b,l), o] = sum_{k,c} xpad[b, l+k, c] * weight[o, c, k]
    w_all = w_ref[...]                                            # (K*C, C)
    if C < 128:
        # Fused im2col matmul: contraction K*C fills the MXU; buffer is small.
        windows = [xpad[:, k:k + L, :].reshape(TB * L, C) for k in range(K)]
        im2col = jnp.concatenate(windows, axis=1)                 # (TB*L, K*C)
        conv = jnp.dot(im2col, w_all, preferred_element_type=jnp.float32)
    else:
        # K accumulated shifted matmuls: no K x activation-size buffer.
        conv = None
        for k in range(K):
            win = xpad[:, k:k + L, :].reshape(TB * L, C)
            contrib = jnp.dot(win, w_all[k * C:(k + 1) * C, :],
                              preferred_element_type=jnp.float32)
            conv = contrib if conv is None else conv + contrib

    conv = conv + b_ref[...]                                      # (TB*L, C)

    # ---- ReLU -----------------------------------------------------------------
    h = jnp.maximum(conv, 0.0).reshape(TB, L, C)

    # ---- Fused LayerNorm over (C, L) per sample -------------------------------
    inv_cl = 1.0 / float(C * L)
    s1 = jnp.sum(jnp.sum(h, axis=2, keepdims=True), axis=1, keepdims=True)
    s2 = jnp.sum(jnp.sum(h * h, axis=2, keepdims=True), axis=1, keepdims=True)
    mean = s1 * inv_cl                                            # (TB, 1, 1)
    var = s2 * inv_cl - mean * mean
    scale = jax.lax.rsqrt(var + LN_EPS)                           # (TB, 1, 1)
    g_eff = g_ref[...][None, :, :] * scale                        # (TB, L, C)
    # (h - mean) * scale * gamma + beta  ==  h*g_eff + (beta - mean*g_eff)
    # Dropout is identity at inference; residual = xt (already channels-last).
    y = h * g_eff + (beta_ref[...][None, :, :] - mean * g_eff) + xt

    # ---- back to native layout and store --------------------------------------
    o_ref[...] = jnp.swapaxes(y, 1, 2).astype(o_ref.dtype)


def _pick_batch_block(n: int, c: int, l: int, k: int) -> int:
    """Batch samples per grid step, sized from a per-step VMEM byte budget."""
    if n <= 1:
        return 1
    lp = l + k - 1
    # Per-sample f32 bytes per step: 2x dbl-buffered input + 2x dbl-buffered
    # output + channels-last copy + padded copy + conv/h + ~3 temporaries.
    per_sample = 4 * c * (7 * l + lp)
    if c < 128:
        per_sample += 4 * k * c * l          # fused im2col buffer
    budget = 16 * 1024 * 1024                # ~half of the 32 MiB scoped VMEM
    tb = max(1, min(n, budget // max(per_sample, 1)))
    while n % tb:
        tb -= 1
    if tb == n and n > 1:
        # Megacore: only force >=2 grid steps when each step keeps a big block.
        half = n // 2
        while half > 1 and n % half:
            half -= 1
        if n % half == 0 and 4 * c * l * half >= (1 << 20):   # >= 1 MiB / block
            tb = half
    return tb


_BUFFERED = getattr(pl, "Buffered", None)


def _const_spec(shape):
    """BlockSpec for a grid-invariant operand; single-buffered when supported."""
    index_map = lambda g: (0,) * len(shape)
    if _BUFFERED is not None:
        try:
            return pl.BlockSpec(shape, index_map, pipeline_mode=_BUFFERED(1))
        except TypeError:
            pass
    return pl.BlockSpec(shape, index_map)


@functools.partial(jax.jit, static_argnames=("kernel_size",))
def residual_block(x, weight, bias, ln_weight, ln_bias, *, kernel_size):
    """x: (N, C, L) f32.  weight: (C, C, K).  bias: (C,).  ln_*: (C, L)."""
    N, C, L = x.shape
    K = kernel_size
    pad_left = (K - 1) // 2
    pad_right = K - 1 - pad_left

    TB = _pick_batch_block(N, C, L, K)
    G = N // TB

    # ---- parameter-only layout prep (tiny, one-off; no x-sized HBM traffic) --
    # weight (C_out, C_in, K) -> (K*C_in, C_out), row order k*C + c_in.
    w2t = jnp.transpose(weight, (2, 1, 0)).reshape(K * C, C)
    b_row = bias.reshape(1, C)
    g_t = jnp.transpose(ln_weight)                                # (L, C)
    beta_t = jnp.transpose(ln_bias)                               # (L, C)

    kernel = functools.partial(_resblock_kernel, C=C, L=L, TB=TB, K=K,
                               pad_left=pad_left, pad_right=pad_right)

    return pl.pallas_call(
        kernel,
        out_shape=jax.ShapeDtypeStruct((N, C, L), x.dtype),
        grid_spec=pltpu.PrefetchScalarGridSpec(
            num_scalar_prefetch=0,
            grid=(G,),
            in_specs=[
                pl.BlockSpec((TB, C, L), lambda g: (g, 0, 0)),    # x (native)
                _const_spec((K * C, C)),                          # conv weight
                _const_spec((1, C)),                              # conv bias
                _const_spec((L, C)),                              # LN gamma^T
                _const_spec((L, C)),                              # LN beta^T
            ],
            out_specs=pl.BlockSpec((TB, C, L), lambda g: (g, 0, 0)),
        ),
        compiler_params=pltpu.CompilerParams(
            dimension_semantics=("parallel",),
            vmem_limit_bytes=32 * 1024 * 1024),
    )(x, w2t, b_row, g_t, beta_t)


def _reference(x, weight, bias, ln_weight, ln_bias, kernel_size):
    """Pure-JAX reference mirroring the PyTorch forward (eval mode)."""
    K = kernel_size
    pad_left = (K - 1) // 2
    x_pad = jnp.pad(x, ((0, 0), (0, 0), (pad_left, K - 1 - pad_left)))
    conv = jax.lax.conv_general_dilated(
        x_pad, weight, window_strides=(1,), padding="VALID",
        dimension_numbers=("NCH", "OIH", "NCH"))
    conv = conv + bias[None, :, None]
    h = jnp.maximum(conv, 0.0)
    mean = jnp.mean(h, axis=(1, 2), keepdims=True)
    var = jnp.mean((h - mean) ** 2, axis=(1, 2), keepdims=True)
    hn = (h - mean) / jnp.sqrt(var + LN_EPS)
    y = hn * ln_weight[None] + ln_bias[None]
    return y + x


if __name__ == "__main__":
    # Module hyperparameters (small, consistent with the forward pass).
    batch = 2
    conv_channels = 4
    input_length = 16
    conv_kernel_size = 3
    # dropout_rate = 0.1  # identity at inference

    key = jax.random.PRNGKey(0)
    k_x, k_w, k_b, k_g, k_beta = jax.random.split(key, 5)

    x = jax.random.normal(k_x, (batch, conv_channels, input_length), jnp.float32)
    # Conv1d weight: (out_channels, in_channels, K); bias: (out_channels,)
    fan_in = conv_channels * conv_kernel_size
    bound = 1.0 / (fan_in ** 0.5)
    conv_w = jax.random.uniform(
        k_w, (conv_channels, conv_channels, conv_kernel_size),
        jnp.float32, -bound, bound)
    conv_b = jax.random.uniform(k_b, (conv_channels,), jnp.float32, -bound, bound)
    # LayerNorm((C, L)) elementwise affine params.
    ln_w = jnp.ones((conv_channels, input_length), jnp.float32) \
        + 0.01 * jax.random.normal(k_g, (conv_channels, input_length), jnp.float32)
    ln_b = 0.01 * jax.random.normal(k_beta, (conv_channels, input_length), jnp.float32)

    out = residual_block(x, conv_w, conv_b, ln_w, ln_b,
                         kernel_size=conv_kernel_size)
    out = jax.block_until_ready(out)

    ref = _reference(x, conv_w, conv_b, ln_w, ln_b, conv_kernel_size)
    assert out.shape == (batch, conv_channels, input_length)
    assert jnp.allclose(out, ref, atol=1e-4, rtol=1e-4), \
        f"max err {jnp.max(jnp.abs(out - ref))}"

    print("KERNEL_OK")
</pallas_src>

<mosaic_0001>
module attributes {stable_mosaic.version = 11 : i64} {
  func.func @_resblock_kernel(%arg0: i32, %arg1: memref<2x4x16xf32, #tpu.memory_space<vmem>>, %arg2: memref<12x4xf32, #tpu.memory_space<vmem>>, %arg3: memref<1x4xf32, #tpu.memory_space<vmem>>, %arg4: memref<16x4xf32, #tpu.memory_space<vmem>>, %arg5: memref<16x4xf32, #tpu.memory_space<vmem>>, %arg6: memref<2x4x16xf32, #tpu.memory_space<vmem>>) attributes {dimension_semantics = [#tpu.dimension_semantics<parallel>], iteration_bounds = array<i64: 1>, scalar_prefetch = 0 : i64, scratch_operands = 0 : i64, tpu.core_type = #tpu.core_type<tc>, window_params = [{transform_indices = @transform_0, window_bounds = array<i64: 2, 4, 16>}, {pipeline_mode = #tpu.pipeline_mode<synchronous>, transform_indices = @transform_1, window_bounds = array<i64: 12, 4>}, {pipeline_mode = #tpu.pipeline_mode<synchronous>, transform_indices = @transform_2, window_bounds = array<i64: 1, 4>}, {pipeline_mode = #tpu.pipeline_mode<synchronous>, transform_indices = @transform_3, window_bounds = array<i64: 16, 4>}, {pipeline_mode = #tpu.pipeline_mode<synchronous>, transform_indices = @transform_4, window_bounds = array<i64: 16, 4>}, {transform_indices = @transform_5, window_bounds = array<i64: 2, 4, 16>}]} {
    %c0 = arith.constant 0 : index
    %c0_0 = arith.constant 0 : index
    %c0_1 = arith.constant 0 : index
    %0 = vector.load %arg1[%c0, %c0_0, %c0_1] : memref<2x4x16xf32, #tpu.memory_space<vmem>>, vector<2x4x16xf32>
    %1 = tpu.transpose %0, [0, 2, 1] : vector<2x4x16xf32> -> vector<2x16x4xf32>
    %cst = arith.constant 0.000000e+00 : f32
    %2 = vector.broadcast %cst : f32 to vector<2x1x4xf32>
    %cst_2 = arith.constant 0.000000e+00 : f32
    %3 = vector.broadcast %cst_2 : f32 to vector<2x1x4xf32>
    %4 = tpu.concatenate %2, %1, %3 in 1 : vector<2x1x4xf32>, vector<2x16x4xf32>, vector<2x1x4xf32> -> vector<2x18x4xf32>
    %c0_3 = arith.constant 0 : index
    %c0_4 = arith.constant 0 : index
    %5 = vector.load %arg2[%c0_3, %c0_4] : memref<12x4xf32, #tpu.memory_space<vmem>>, vector<12x4xf32>
    %6 = vector.extract_strided_slice %4 {offsets = [0, 0, 0], sizes = [2, 16, 4], strides = [1, 1, 1]} : vector<2x18x4xf32> to vector<2x16x4xf32>
    %7 = vector.shape_cast %6 : vector<2x16x4xf32> to vector<32x4xf32>
    %8 = vector.extract_strided_slice %4 {offsets = [0, 1, 0], sizes = [2, 16, 4], strides = [1, 1, 1]} : vector<2x18x4xf32> to vector<2x16x4xf32>
    %9 = vector.shape_cast %8 : vector<2x16x4xf32> to vector<32x4xf32>
    %10 = vector.extract_strided_slice %4 {offsets = [0, 2, 0], sizes = [2, 16, 4], strides = [1, 1, 1]} : vector<2x18x4xf32> to vector<2x16x4xf32>
    %11 = vector.shape_cast %10 : vector<2x16x4xf32> to vector<32x4xf32>
    %12 = tpu.concatenate %7, %9, %11 in 1 : vector<32x4xf32>, vector<32x4xf32>, vector<32x4xf32> -> vector<32x12xf32>
    %cst_5 = arith.constant dense<0.000000e+00> : vector<32x4xf32>
    %13 = tpu.matmul %12, %5, %cst_5 {dimension_numbers = #tpu.dot_dimension_numbers<[1], [0], [0], [1], [0, 0, 1, 1], [], []>} : vector<32x12xf32>, vector<12x4xf32>, vector<32x4xf32> -> vector<32x4xf32>
    %c0_6 = arith.constant 0 : index
    %c0_7 = arith.constant 0 : index
    %14 = vector.load %arg3[%c0_6, %c0_7] : memref<1x4xf32, #tpu.memory_space<vmem>>, vector<1x4xf32>
    %15 = vector.broadcast %14 : vector<1x4xf32> to vector<32x4xf32>
    %16 = arith.addf %13, %15 : vector<32x4xf32>
    %cst_8 = arith.constant 0.000000e+00 : f32
    %17 = vector.broadcast %cst_8 : f32 to vector<32x4xf32>
    %18 = arith.maximumf %16, %17 : vector<32x4xf32>
    %19 = vector.shape_cast %18 : vector<32x4xf32> to vector<2x16x4xf32>
    %cst_9 = arith.constant dense<0.000000e+00> : vector<2x16xf32>
    %20 = vector.multi_reduction <add>, %19, %cst_9 [2] : vector<2x16x4xf32> to vector<2x16xf32>
    %21 = vector.shape_cast %20 : vector<2x16xf32> to vector<2x16x1xf32>
    %cst_10 = arith.constant dense<0.000000e+00> : vector<2x1xf32>
    %22 = vector.multi_reduction <add>, %21, %cst_10 [1] : vector<2x16x1xf32> to vector<2x1xf32>
    %23 = vector.shape_cast %22 : vector<2x1xf32> to vector<2x1x1xf32>
    %24 = arith.mulf %19, %19 : vector<2x16x4xf32>
    %cst_11 = arith.constant dense<0.000000e+00> : vector<2x16xf32>
    %25 = vector.multi_reduction <add>, %24, %cst_11 [2] : vector<2x16x4xf32> to vector<2x16xf32>
    %26 = vector.shape_cast %25 : vector<2x16xf32> to vector<2x16x1xf32>
    %cst_12 = arith.constant dense<0.000000e+00> : vector<2x1xf32>
    %27 = vector.multi_reduction <add>, %26, %cst_12 [1] : vector<2x16x1xf32> to vector<2x1xf32>
    %28 = vector.shape_cast %27 : vector<2x1xf32> to vector<2x1x1xf32>
    %cst_13 = arith.constant 1.562500e-02 : f32
    %29 = vector.broadcast %cst_13 : f32 to vector<2x1x1xf32>
    %30 = arith.mulf %23, %29 : vector<2x1x1xf32>
    %cst_14 = arith.constant 1.562500e-02 : f32
    %31 = vector.broadcast %cst_14 : f32 to vector<2x1x1xf32>
    %32 = arith.mulf %28, %31 : vector<2x1x1xf32>
    %33 = arith.mulf %30, %30 : vector<2x1x1xf32>
    %34 = arith.subf %32, %33 : vector<2x1x1xf32>
    %cst_15 = arith.constant 9.99999974E-6 : f32
    %35 = vector.broadcast %cst_15 : f32 to vector<2x1x1xf32>
    %36 = arith.addf %34, %35 : vector<2x1x1xf32>
    %37 = math.rsqrt %36 : vector<2x1x1xf32>
    %c0_16 = arith.constant 0 : index
    %c0_17 = arith.constant 0 : index
    %38 = vector.load %arg4[%c0_16, %c0_17] : memref<16x4xf32, #tpu.memory_space<vmem>>, vector<16x4xf32>
    %39 = vector.shape_cast %38 : vector<16x4xf32> to vector<1x16x4xf32>
    %40 = vector.broadcast %39 : vector<1x16x4xf32> to vector<2x16x4xf32>
    %41 = vector.broadcast %37 : vector<2x1x1xf32> to vector<2x16x4xf32>
    %42 = arith.mulf %40, %41 : vector<2x16x4xf32>
    %43 = arith.mulf %19, %42 : vector<2x16x4xf32>
    %c0_18 = arith.constant 0 : index
    %c0_19 = arith.constant 0 : index
    %44 = vector.load %arg5[%c0_18, %c0_19] : memref<16x4xf32, #tpu.memory_space<vmem>>, vector<16x4xf32>
    %45 = vector.shape_cast %44 : vector<16x4xf32> to vector<1x16x4xf32>
    %46 = vector.broadcast %30 : vector<2x1x1xf32> to vector<2x16x4xf32>
    %47 = arith.mulf %46, %42 : vector<2x16x4xf32>
    %48 = vector.broadcast %45 : vector<1x16x4xf32> to vector<2x16x4xf32>
    %49 = arith.subf %48, %47 : vector<2x16x4xf32>
    %50 = arith.addf %43, %49 : vector<2x16x4xf32>
    %51 = arith.addf %50, %1 : vector<2x16x4xf32>
    %52 = tpu.transpose %51, [0, 2, 1] : vector<2x16x4xf32> -> vector<2x4x16xf32>
    %c0_20 = arith.constant 0 : index
    %c0_21 = arith.constant 0 : index
    %c0_22 = arith.constant 0 : index
    %53 = vector.load %arg6[%c0_20, %c0_21, %c0_22] : memref<2x4x16xf32, #tpu.memory_space<vmem>>, vector<2x4x16xf32>
    tpu.vector_store %arg6[%c0_20, %c0_21, %c0_22], %52 {strides = array<i32>} : memref<2x4x16xf32, #tpu.memory_space<vmem>>, vector<2x4x16xf32>,
    return
  }
  func.func @transform_0(%arg0: i32) -> (i32, i32, i32) {
    %c0_i32 = arith.constant 0 : i32
    %c0_i32_0 = arith.constant 0 : i32
    %c0_i32_1 = arith.constant 0 : i32
    return %arg0, %c0_i32, %c0_i32_0 : i32, i32, i32
  }
  func.func @transform_1(%arg0: i32) -> (i32, i32) {
    %c0_i32 = arith.constant 0 : i32
    %c0_i32_0 = arith.constant 0 : i32
    %c0_i32_1 = arith.constant 0 : i32
    return %c0_i32, %c0_i32_0 : i32, i32
  }
  func.func @transform_2(%arg0: i32) -> (i32, i32) {
    %c0_i32 = arith.constant 0 : i32
    %c0_i32_0 = arith.constant 0 : i32
    %c0_i32_1 = arith.constant 0 : i32
    return %c0_i32, %c0_i32_0 : i32, i32
  }
  func.func @transform_3(%arg0: i32) -> (i32, i32) {
    %c0_i32 = arith.constant 0 : i32
    %c0_i32_0 = arith.constant 0 : i32
    %c0_i32_1 = arith.constant 0 : i32
    return %c0_i32, %c0_i32_0 : i32, i32
  }
  func.func @transform_4(%arg0: i32) -> (i32, i32) {
    %c0_i32 = arith.constant 0 : i32
    %c0_i32_0 = arith.constant 0 : i32
    %c0_i32_1 = arith.constant 0 : i32
    return %c0_i32, %c0_i32_0 : i32, i32
  }
  func.func @transform_5(%arg0: i32) -> (i32, i32, i32) {
    %c0_i32 = arith.constant 0 : i32
    %c0_i32_0 = arith.constant 0 : i32
    %c0_i32_1 = arith.constant 0 : i32
    return %arg0, %c0_i32, %c0_i32_0 : i32, i32, i32
  }
}

</mosaic_0001>

<bundles_post_ra>
// kernel: residual_block.1
= control target key start
LH: loop header
LB: loop body
LE: loop exit
PB: predicated region body
PF: predicated region fallthrough
CT: control target
= control target key end

     0   :  { %s663_s0 = inlined_call_operand.vmem [shape: f32[2,4,16], index: 0, kind: input, shape index: {}]   ;;  %s664_s1 = inlined_call_operand.vmem [shape: f32[12,4], index: 1, kind: input, shape index: {}]   ;;  %s665_s2 = inlined_call_operand.vmem [shape: f32[1,4], index: 2, kind: input, shape index: {}]   ;;  %s666_s3 = inlined_call_operand.vmem [shape: f32[16,4], index: 3, kind: input, shape index: {}]   ;;  %s667_s4 = inlined_call_operand.vmem [shape: f32[16,4], index: 4, kind: input, shape index: {}]   ;;  %s668_s5 = inlined_call_operand.hbm [shape: f32[2,4,16], index: 5, kind: output, shape index: {}]  }
   0x1   :  { %v21_v0 = vld [vmem:[%s663_s0] sm:$0xf] }
   0x2   :  { %23 = vxpose.xlu0.b32.start.end [1/1] (short) (narrow) %v21_v0, 16 }
   0x3   :  { %10 = vsyncpa [#allocation3], 0  ;;  %v22_v1 = vld [vmem:[%s663_s0 + $0x4] sm:$0xf]  ;;  %vm91_vm0 = vcmask 1040384   ;;  %vm114_vm1 = vcmask 1046528  }
   0x4   :  { %s519_s0 = smov 4   ;;  %v109_v22 = vld [vmem:[%s664_s1 + $0x8] sm:$0xf]  ;;  %vm190_vm2 = vcmask 1043456   ;;  %v108_v26 = vld [vmem:[%s664_s1] sm:$0xff]  ;;  %vm125_vm3 = vcmask 1045504  }
   0x5   :  { %474 = vmatprep.subr.msk.mxu0 %vm190_vm2, %v109_v22  ;;  %484 = vmatprep.subr.msk.mxu1 %vm190_vm2, %v109_v22  ;;  %s520_s26 = smov 8   ;;  %vm160_vm4 = vcmask 31744   ;;  %vm165_vm5 = vcmask 64512   ;;  %vm177_vm6 = vcmask 97280   ;;  %v462_v54 = vld [vmem:[%s665_s2] ss:$0 sm:$0xff] }
   0x6   :  { %475 = vmatpush3.msk.msra.mxu0 %vm190_vm2, %v109_v22  ;;  %486 = vmatpush3.msk.msra.mxu1 %vm190_vm2, %v109_v22  ;;  %vm443_vm7 = vcmask 125952  }
   0x7   :  { %55 = vxpose.xlu0.b32.start.end [1/1] (short) (narrow) %v22_v1, 16  ;;  %476 = vmatprep.subr.mxu0 %v108_v26 }
   0x8   :  { %477 = vmatpush3.msra.mxu0 %v108_v26  ;;  %485 = vmatprep.subr.mxu1 %v108_v26 }
   0x9   :  { %487 = vmatpush3.msra.mxu1 %v108_v26 }
  0x7e   :  { %v559_v2 = vpop.trf.xlu0 }
  0x7f   :  { %v92_v3 = vrot.slane %v559_v2, 7 }
  0x81   :  { %v104_v5 = vsel %vm91_vm0, 0.0, %v92_v3 }
  0x82   :  { %v562_v4 = vpop.trf.xlu0  ;;  %v115_v9 = vrot.slane %v104_v5, 1  ;;  %v126_v29 = vrot.slane %v104_v5, 2 }
  0x83   :  { %v93_v6 = vrot.slane %v562_v4, 7 }
  0x85   :  { %v567_v7 = vsel %vm91_vm0, %v92_v3, %v93_v6  ;;  %v106_v16 = vsel %vm91_vm0, %v93_v6, 0.0 }
  0x86   :  { %v569_v8 = vpop.trf.xlu0  ;;  %v116_v10 = vrot.slane %v567_v7, 1  ;;  %v118_v23 = vrot.slane %v106_v16, 1  ;;  %v127_v28 = vrot.slane %v567_v7, 2  ;;  %v129_v33 = vrot.slane %v106_v16, 2 }
  0x87   :  { %v95_v11 = vrot.slane %v569_v8, 7 }
  0x88   :  { %v117_v12 = vsel %vm114_vm1, %v115_v9, %v116_v10  ;;  %v119_v27 = vsel %vm114_vm1, %v116_v10, %v118_v23  ;;  %v128_v30 = vsel %vm125_vm3, %v126_v29, %v127_v28  ;;  %v130_v36 = vsel %vm125_vm3, %v127_v28, %v129_v33 }
  0x89   :  { %136 = vrot.lane.b32.xlu1 %v117_v12, %s519_s0  ;;  %v105_v14 = vsel %vm91_vm0, 0.0, %v95_v11 }
  0x8a   :  { %v575_v13 = vpop.trf.xlu0  ;;  %v120_v19 = vrot.slane %v105_v14, 1  ;;  %v131_v32 = vrot.slane %v105_v14, 2 }
  0x8b   :  { %v96_v15 = vrot.slane %v575_v13, 7 }
  0x8d   :  { %v97_v17 = vsel %vm91_vm0, %v95_v11, %v96_v15  ;;  %v107_v18 = vsel %vm91_vm0, %v96_v15, 0.0 }
  0x8e   :  { %v123_v20 = vrot.slane %v107_v18, 1  ;;  %v121_v21 = vrot.slane %v97_v17, 1  ;;  %v132_v31 = vrot.slane %v97_v17, 2  ;;  %v134_v35 = vrot.slane %v107_v18, 2 }
  0x90   :  { %v124_v24 = vsel %vm114_vm1, %v121_v21, %v123_v20  ;;  %v122_v25 = vsel %vm114_vm1, %v120_v19, %v121_v21  ;;  %v133_v34 = vsel %vm125_vm3, %v131_v32, %v132_v31  ;;  %v135_v37 = vsel %vm125_vm3, %v132_v31, %v134_v35 }
  0x91   :  { %142 = vrot.lane.b32.xlu0 %v124_v24, %s519_s0  ;;  %140 = vrot.lane.b32.xlu1 %v122_v25, %s519_s0 }
  0x95   :  { %138 = vrot.lane.b32.xlu1 %v119_v27, %s519_s0 }
  0x99   :  { %148 = vrot.lane.b32.xlu1 %v128_v30, %s520_s26 }
  0x9d   :  { %152 = vrot.lane.b32.xlu1 %v133_v34, %s520_s26 }
  0xa1   :  { %150 = vrot.lane.b32.xlu1 %v130_v36, %s520_s26 }
  0xa5   :  { %154 = vrot.lane.b32.xlu1 %v135_v37, %s520_s26 }
  0xfb   :  { %v137_v38 = vpop.permute.xlu1 %136 }
  0xfc   :  { %v161_v41 = vsel %vm160_vm4, %v104_v5, %v137_v38 }
 0x103   :  { %v141_v39 = vpop.permute.xlu1 %140  ;;  %v143_v49 = vpop.permute.xlu0 %142 }
 0x104   :  { %v163_v44 = vsel %vm160_vm4, %v105_v14, %v141_v39  ;;  %v164_v51 = vsel %vm160_vm4, %v97_v17, %v143_v49 }
 0x107   :  { %v139_v40 = vpop.permute.xlu1 %138 }
 0x108   :  { %v162_v47 = vsel %vm160_vm4, %v567_v7, %v139_v40 }
 0x10b   :  { %v149_v42 = vpop.permute.xlu1 %148 }
 0x10c   :  { %v166_v43 = vsel %vm165_vm5, %v161_v41, %v149_v42 }
 0x10d   :  { %478 = vmatprep.mubr.msk.f32.mxu0 %vm177_vm6, %v166_v43 }
 0x10f   :  { %v153_v45 = vpop.permute.xlu1 %152 }
 0x110   :  { %v168_v46 = vsel %vm165_vm5, %v163_v44, %v153_v45 }
 0x111   :  { %481 = vmatprep.mubr.msk.f32.mxu1 %vm177_vm6, %v168_v46 }
 0x113   :  { %v151_v48 = vpop.permute.xlu1 %150 }
 0x114   :  { %v167_v50 = vsel %vm165_vm5, %v162_v47, %v151_v48 }
 0x115   :  { %479 = vmatmul.mubr.msk.f32.vlgmr.msra.gmra.mxu0 %vm177_vm6, %v167_v50 }
 0x117   :  { %v155_v52 = vpop.permute.xlu1 %154 }
 0x118   :  { %v169_v53 = vsel %vm165_vm5, %v164_v51, %v155_v52 }
 0x119   :  { %482 = vmatmul.mubr.msk.f32.vlgmr.msra.gmra.mxu1 %vm177_vm6, %v169_v53 }
 0x1d5   :  { %v480_v55 = vpop.f32.mrf.mxu0 }
 0x1d6   :  { %v266_v56 = vadd.f32 %v480_v55, %v462_v54 }
 0x1d7   :  { %v260_v57 = vpop.f32.mrf.mxu0 }
 0x1d8   :  { %v611_v58 = vmax.f32 %v266_v56, 0.0  ;;  %v261_v60 = vadd.f32 %v462_v54, %v260_v57 }
 0x1d9   :  { %v483_v59 = vpop.f32.mrf.mxu1 }
 0x1da   :  { %v276_v61 = vadd.f32 %v483_v59, %v462_v54  ;;  %v286_v62 = vsel %vm160_vm4, %v611_v58, 0.0  ;;  %v617_v1 = vmax.f32 %v261_v60, 0.0  ;;  %v310_v10 = vmul.f32 %v611_v58, %v611_v58 }
 0x1db   :  { %287 = vadd.xlane.f32.xlu0 %v286_v62  ;;  %v270_v63 = vpop.f32.mrf.mxu1 }
 0x1dc   :  { %v615_v0 = vmax.f32 %v276_v61, 0.0  ;;  %v271_v3 = vadd.f32 %v462_v54, %v270_v63  ;;  %v283_v7 = vsel %vm160_vm4, %v617_v1, 0.0  ;;  %v316_v11 = vsel %vm160_vm4, %v310_v10, 0.0 }
 0x1dd   :  { %v309_v12 = vmul.f32 %v617_v1, %v617_v1 }
 0x1de   :  { %v292_v5 = vsel %vm160_vm4, %v615_v0, 0.0  ;;  %v621_v6 = vmax.f32 %v271_v3, 0.0  ;;  %v312_v17 = vmul.f32 %v615_v0, %v615_v0 }
 0x1df   :  { %293 = vadd.xlane.f32.xlu1 %v292_v5  ;;  %v313_v14 = vsel %vm160_vm4, %v309_v12, 0.0 }
 0x1e0   :  { %v289_v9 = vsel %vm160_vm4, %v621_v6, 0.0  ;;  %v311_v15 = vmul.f32 %v621_v6, %v621_v6  ;;  %v322_v18 = vsel %vm160_vm4, %v312_v17, 0.0 }
 0x1e2   :  { %v319_v16 = vsel %vm160_vm4, %v311_v15, 0.0  ;;  %v362_v15 = vld [vmem:[%s667_s4 + $0x8] sm:$0xff] }
 0x1e3   :  { %284 = vadd.xlane.f32.xlu1 %v283_v7  ;;  %v351_v7 = vld [vmem:[%s666_s3] sm:$0xff] }
 0x1e7   :  { %290 = vadd.xlane.f32.xlu1 %v289_v9  ;;  %v352_v9 = vld [vmem:[%s666_s3 + $0x8] sm:$0xff]  ;;  %s521_s3 = smov [#allocation2]  }
 0x1eb   :  { %317 = vadd.xlane.f32.xlu1 %v316_v11 }
 0x1ef   :  { %314 = vadd.xlane.f32.xlu1 %v313_v14  ;;  %v361_v14 = vld [vmem:[%s667_s4] sm:$0xff]  ;;  %s451_s4 = sshll.u32 %s521_s3, 4  ;;  %s452_s4 = int_to_ptr.vmem [resolvable:$true] %s451_s4 }
 0x1f0   :  { %s497_s10 = scalar_lea.vmem %s452_s4, 128  ;;  %p502_p1 = scmp.lt.s32.totalorder %s452_s4, %s452_s4 }
 0x1f1   :  { %p498_p0 = scmp.ne.s32.totalorder %s452_s4, %s497_s10  ;;  %p503_p2 = scmp.lt.s32.totalorder %s497_s10, %s497_s10 }
 0x1f3   :  { %320 = vadd.xlane.f32.xlu1 %v319_v16  ;;  %p504_p3 = por %p503_p2, %p502_p1 }
 0x1f5   :  { %p505_p4 = pnand %p504_p3, %p498_p0 }
 0x1f7   :  { %323 = vadd.xlane.f32.xlu1 %v322_v18 }
 0x264   :  { %v288_v20 = vpop.xlane.xlu0 %287 }
 0x268   :  { %v294_v19 = vpop.xlane.xlu1 %293 }
 0x26c   :  { %v285_v21 = vpop.xlane.xlu1 %284 }
 0x26d   :  { %v295_v22 = vadd.f32 %v288_v20, %v285_v21 }
 0x26f   :  { %v296_v23 = vrot.slane %v295_v22, 4 }
 0x270   :  { %v291_v24 = vpop.xlane.xlu1 %290 }
 0x271   :  { %v297_v25 = vadd.f32 %v296_v23, %v295_v22  ;;  %v302_v26 = vadd.f32 %v294_v19, %v291_v24 }
 0x273   :  { %v298_v27 = vrot.slane %v297_v25, 2  ;;  %v303_v28 = vrot.slane %v302_v26, 4 }
 0x274   :  { %v318_v29 = vpop.xlane.xlu1 %317 }
 0x275   :  { %v299_v30 = vadd.f32 %v298_v27, %v297_v25  ;;  %v304_v31 = vadd.f32 %v303_v28, %v302_v26 }
 0x277   :  { %v300_v34 = vrot.slane %v299_v30, 1  ;;  %v305_v35 = vrot.slane %v304_v31, 2 }
 0x278   :  { %v315_v32 = vpop.xlane.xlu1 %314 }
 0x279   :  { %v325_v33 = vadd.f32 %v318_v29, %v315_v32  ;;  %v301_v39 = vadd.f32 %v300_v34, %v299_v30  ;;  %v306_v40 = vadd.f32 %v305_v35, %v304_v31 }
 0x27b   :  { %v326_v36 = vrot.slane %v325_v33, 4  ;;  %v339_v45 = vmul.f32 0.015625, %v301_v39  ;;  %v307_v46 = vrot.slane %v306_v40, 1 }
 0x27c   :  { %v321_v37 = vpop.xlane.xlu1 %320 }
 0x27d   :  { %v327_v38 = vadd.f32 %v326_v36, %v325_v33  ;;  %v308_v51 = vadd.f32 %v307_v46, %v306_v40  ;;  %v343_v52 = vmul.f32 %v339_v45, %v339_v45 }
 0x27f   :  { %v328_v41 = vrot.slane %v327_v38, 2  ;;  %v340_v57 = vmul.f32 0.015625, %v308_v51 }
 0x280   :  { %v324_v42 = vpop.xlane.xlu1 %323 }
 0x281   :  { %v329_v43 = vadd.f32 %v328_v41, %v327_v38  ;;  %v332_v44 = vadd.f32 %v324_v42, %v321_v37  ;;  %v344_v62 = vmul.f32 %v340_v57, %v340_v57 }
 0x283   :  { %v330_v47 = vrot.slane %v329_v43, 1  ;;  %v333_v48 = vrot.slane %v332_v44, 4 }
 0x285   :  { %v331_v49 = vadd.f32 %v330_v47, %v329_v43  ;;  %v334_v50 = vadd.f32 %v333_v48, %v332_v44 }
 0x287   :  { %v341_v53 = vmul.f32 0.015625, %v331_v49  ;;  %v335_v54 = vrot.slane %v334_v50, 2 }
 0x289   :  { %v345_v55 = vsub.f32 %v341_v53, %v343_v52  ;;  %v336_v56 = vadd.f32 %v335_v54, %v334_v50 }
 0x28b   :  { %v347_v59 = vadd.f32 1e-05, %v345_v55  ;;  %v337_v60 = vrot.slane %v336_v56, 1 }
 0x28d   :  { %493 = vrsqrt.f32 %v347_v59  ;;  %v338_v61 = vadd.f32 %v337_v60, %v336_v56 }
 0x28f   :  { %v342_v63 = vmul.f32 0.015625, %v338_v61 }
 0x291   :  { %v346_v3 = vsub.f32 %v342_v63, %v344_v62 }
 0x293   :  { %v348_v5 = vadd.f32 1e-05, %v346_v3 }
 0x295   :  { %495 = vrsqrt.f32 %v348_v5 }
 0x29a   :  { %v494_v10 = vpop.eup %493 }
 0x29b   :  { %v353_v11 = vmul.f32 %v494_v10, %v351_v7  ;;  %v354_v12 = vmul.f32 %v494_v10, %v352_v9 }
 0x29d   :  { %v363_v16 = vmul.f32 %v353_v11, %v339_v45  ;;  %v364_v17 = vmul.f32 %v354_v12, %v339_v45  ;;  %v357_v18 = vmul.f32 %v353_v11, %v617_v1  ;;  %v358_v22 = vmul.f32 %v354_v12, %v611_v58 }
 0x29f   :  { %v367_v19 = vsub.f32 %v361_v14, %v363_v16  ;;  %v368_v20 = vsub.f32 %v362_v15, %v364_v17 }
 0x2a1   :  { %v371_v21 = vadd.f32 %v367_v19, %v357_v18  ;;  %v372_v25 = vadd.f32 %v368_v20, %v358_v22 }
 0x2a2   :  { %v496_v23 = vpop.eup %495 }
 0x2a3   :  { %v375_v24 = vadd.f32 %v371_v21, %v559_v2  ;;  %v355_v26 = vmul.f32 %v496_v23, %v351_v7  ;;  %v356_v27 = vmul.f32 %v496_v23, %v352_v9  ;;  %v376_v30 = vadd.f32 %v372_v25, %v562_v4 }
 0x2a5   :  { %379 = vxpose.xlu0.b32.start [1/2] (short) (narrow) %v375_v24, 8  ;;  %v365_v28 = vmul.f32 %v355_v26, %v340_v57  ;;  %v366_v29 = vmul.f32 %v356_v27, %v340_v57  ;;  %v359_v31 = vmul.f32 %v355_v26, %v621_v6  ;;  %v360_v34 = vmul.f32 %v356_v27, %v615_v0 }
 0x2a7   :  { %v369_v32 = vsub.f32 %v361_v14, %v365_v28  ;;  %v370_v1 = vsub.f32 %v362_v15, %v366_v29 }
 0x2a9   :  { %380 = vxpose.xlu0.b32.end [2/2] (short) (narrow) %v376_v30, 8  ;;  %v373_v33 = vadd.f32 %v369_v32, %v359_v31  ;;  %v374_v35 = vadd.f32 %v370_v1, %v360_v34 }
 0x2ab   :  { %v377_v58 = vadd.f32 %v373_v33, %v569_v8  ;;  %v378_v2 = vadd.f32 %v374_v35, %v575_v13 }
 0x2ad   :  { %411 = vxpose.xlu1.b32.start [1/2] (short) (narrow) %v377_v58, 8 }
 0x2b1   :  { %412 = vxpose.xlu1.b32.end [2/2] (short) (narrow) %v378_v2, 8 }
 0x321   :  { %v395_v36 = vpop.trf.xlu0 }
 0x322   :  { %444 = vst.msk [vmem:[#allocation2] sm:$0xf] %vm443_vm7, %v395_v36 }
 0x329   :  { %v427_v4 = vpop.trf.xlu1 }
 0x32a   :  { %445 = vst.msk [vmem:[#allocation2 + $0x4] sm:$0xf] %vm443_vm7, %v427_v4 }
 0x32b   :  { %508 = shalt.err (!%p505_p4)
}
 0x32c   :  { %s522_s11 = smov 64  }
 0x32d   :  { %457 = dma.vmem_to_hbm [thread:$0]  %s452_s4, 128, %s668_s5, [#allocation3], %s522_s11, %s522_s11, %s519_s0  }
 0x32e   :  { %517 = dma.done.wait [#allocation3], 128  }
 0x32f   :  { %518 = vsyncadd [#allocation3], 4294967168 }
 0x330   :  { %461 = vsyncpa [#allocation3], 1 }

</bundles_post_ra>
